<compile_context>
chip_gen: v7x
topology: tpu7x:2x2x1
jax: 0.10.0
libtpu: 0.0.40
codegen_flags: <defaults>
</compile_context>

<pallas_src>
import functools

import jax
import jax.numpy as jnp
from jax.experimental import pallas as pl
from jax.experimental.pallas import tpu as pltpu


def gcn_fused_kernel(*args, num_layers: int):
    """Fused multi-layer GCN in transposed (feature-major, node-on-lane) layout.

    args = (m_ref, x_ref, w1_ref, b1_ref, ..., wL_ref, bL_ref, o_ref)
      m_ref : [N, N]      bf16, = adj_t^T (used as right-multiplication)
      x_ref : [F0, N]     bf16, = X^T
      w_ref : [Fo, Fi]    bf16, = W^T
      b_ref : [Fo, 1]     f32
      o_ref : [F_last, N] f32, = H_last^T
    """
    m_ref = args[0]
    x_ref = args[1]
    o_ref = args[-1]
    wb_refs = args[2:2 + 2 * num_layers]

    m = m_ref[...]            # adjacency^T stays resident for all layers
    h = x_ref[...]            # current activation, [F, N], bf16

    for li in range(num_layers):
        w = wb_refs[2 * li][...]        # [fo, fi] bf16
        b = wb_refs[2 * li + 1][...]    # [fo, 1]  f32
        fo, fi = w.shape
        if fi < fo:
            # Aggregate first: N*N*fi + N*fi*fo MACs (cheaper when fi < fo).
            agg = jnp.dot(h, m, preferred_element_type=jnp.float32)        # [fi, N]
            z = jnp.dot(w, agg.astype(jnp.bfloat16),
                        preferred_element_type=jnp.float32)                # [fo, N]
        else:
            # Transform first: N*fi*fo + N*N*fo MACs.
            t = jnp.dot(w, h, preferred_element_type=jnp.float32)          # [fo, N]
            z = jnp.dot(t.astype(jnp.bfloat16), m,
                        preferred_element_type=jnp.float32)                # [fo, N]
        z = z + b                      # bias broadcasts over the lane (node) axis
        if li < num_layers - 1:
            # TODO(synk): dropout is identity here (module evaluated with training=False)
            h = jnp.maximum(z, 0.0).astype(jnp.bfloat16)
        else:
            h = z                      # last layer: no ReLU, keep f32

    o_ref[...] = h.astype(o_ref.dtype)


def gcn_forward(x, adj_t, params):
    """Runs the whole GCN stack in one fused Pallas kernel. Returns [N, F_out]."""
    n, f_in = x.shape
    num_layers = len(params)
    f_out_last = params[-1][0].shape[1]

    # Transposed, bf16 operands (f32 accumulation happens inside the kernel).
    m = adj_t.T.astype(jnp.bfloat16)           # [N, N]  = adj_t^T
    x_t = x.T.astype(jnp.bfloat16)             # [F0, N] nodes on the lane axis

    kernel_inputs = [m, x_t]
    in_specs = [
        pl.BlockSpec((n, n), lambda i: (0, 0)),
        pl.BlockSpec((f_in, n), lambda i: (0, 0)),
    ]
    flops = 0
    for w, b in params:
        fi, fo = w.shape
        w_t = w.T.astype(jnp.bfloat16)         # [fo, fi]
        b_t = b.reshape(fo, 1).astype(jnp.float32)
        kernel_inputs += [w_t, b_t]
        in_specs += [
            pl.BlockSpec((fo, fi), lambda i: (0, 0)),
            pl.BlockSpec((fo, 1), lambda i: (0, 0)),
        ]
        flops += 2 * (n * n * min(fi, fo) + n * fi * fo)

    bytes_accessed = int(
        sum(v.size * v.dtype.itemsize for v in kernel_inputs)
        + n * f_out_last * 4
    )

    kernel = functools.partial(gcn_fused_kernel, num_layers=num_layers)
    h_t = pl.pallas_call(
        kernel,
        out_shape=jax.ShapeDtypeStruct((f_out_last, n), jnp.float32),
        grid=(1,),
        in_specs=in_specs,
        out_specs=pl.BlockSpec((f_out_last, n), lambda i: (0, 0)),
        compiler_params=pltpu.CompilerParams(
            dimension_semantics=("arbitrary",)),
        cost_estimate=pl.CostEstimate(
            flops=flops, transcendentals=0, bytes_accessed=bytes_accessed),
    )(*kernel_inputs)

    return h_t.T                               # back to module layout [N, F_out]


# ---------------------------------------------------------------------------
# Parameter init (matches GCNConv: glorot weight, zero bias)
# ---------------------------------------------------------------------------
def glorot(key, shape, dtype=jnp.float32):
    fan_in, fan_out = shape
    limit = jnp.sqrt(6.0 / (fan_in + fan_out))
    return jax.random.uniform(key, shape, dtype, minval=-limit, maxval=limit)


def init_gcn_params(key, in_channels, hidden_channels, out_channels, num_layers):
    dims = [in_channels] + [hidden_channels] * (num_layers - 1) + [out_channels]
    params = []
    for li in range(num_layers):
        key, wk = jax.random.split(key)
        w = glorot(wk, (dims[li], dims[li + 1]))
        b = jnp.zeros((1, dims[li + 1]), jnp.float32)
        params.append((w, b))
    return params


# ---------------------------------------------------------------------------
# References
# ---------------------------------------------------------------------------
def gcn_forward_ref_f32(x, adj_t, params):
    """Pure f32 module semantics: H = adj_t @ (X @ W) + b, ReLU on hidden layers."""
    for w, b in params[:-1]:
        x = jnp.maximum(adj_t @ (x @ w) + b, 0.0)
    w, b = params[-1]
    return adj_t @ (x @ w) + b


def gcn_forward_ref_matched(x, adj_t, params):
    """Reference applying the exact same bf16 casts / association as the kernel."""
    m = adj_t.T.astype(jnp.bfloat16)
    h = x.T.astype(jnp.bfloat16)
    num_layers = len(params)
    for li, (w, b) in enumerate(params):
        fi, fo = w.shape
        w_t = w.T.astype(jnp.bfloat16)
        b_t = b.reshape(fo, 1).astype(jnp.float32)
        if fi < fo:
            agg = jnp.dot(h, m, preferred_element_type=jnp.float32)
            z = jnp.dot(w_t, agg.astype(jnp.bfloat16),
                        preferred_element_type=jnp.float32)
        else:
            t = jnp.dot(w_t, h, preferred_element_type=jnp.float32)
            z = jnp.dot(t.astype(jnp.bfloat16), m,
                        preferred_element_type=jnp.float32)
        z = z + b_t
        if li < num_layers - 1:
            h = jnp.maximum(z, 0.0).astype(jnp.bfloat16)
        else:
            h = z
    return h.T


if __name__ == "__main__":
    key = jax.random.PRNGKey(0)

    # Small, module-consistent shapes.
    num_nodes = 128
    in_channels = 16
    hidden_channels = 32
    out_channels = 8
    num_layers = 3
    dropout = 0.5  # inactive at inference

    k_x, k_a, k_p = jax.random.split(key, 3)
    x = jax.random.normal(k_x, (num_nodes, in_channels), jnp.float32)
    # Symmetric dense 0/1 adjacency (stand-in for the adj_t sparse tensor).
    a_rand = jax.random.uniform(k_a, (num_nodes, num_nodes))
    adj_t = (a_rand < 0.05).astype(jnp.float32)
    adj_t = jnp.maximum(adj_t, adj_t.T)

    params = init_gcn_params(k_p, in_channels, hidden_channels,
                             out_channels, num_layers)

    out = gcn_forward(x, adj_t, params)
    out = jax.block_until_ready(out)
    assert out.shape == (num_nodes, out_channels)

    # Tight check against a reference using identical bf16/f32 numerics.
    ref_matched = gcn_forward_ref_matched(x, adj_t, params)
    assert jnp.allclose(out, ref_matched, atol=1e-3, rtol=1e-3)

    # Loose check against the pure-f32 module semantics (bf16 operand rounding only).
    ref_f32 = gcn_forward_ref_f32(x, adj_t, params)
    assert jnp.allclose(out, ref_f32, atol=1.0, rtol=0.25)

    print("KERNEL_OK")
</pallas_src>

<mosaic_0001>
module attributes {stable_mosaic.version = 11 : i64} {
  func.func @gcn_fused_kernel(%arg0: i32, %arg1: memref<128x128xbf16, #tpu.memory_space<vmem>>, %arg2: memref<16x128xbf16, #tpu.memory_space<vmem>>, %arg3: memref<32x16xbf16, #tpu.memory_space<vmem>>, %arg4: memref<32x1xf32, #tpu.memory_space<vmem>>, %arg5: memref<32x32xbf16, #tpu.memory_space<vmem>>, %arg6: memref<32x1xf32, #tpu.memory_space<vmem>>, %arg7: memref<8x32xbf16, #tpu.memory_space<vmem>>, %arg8: memref<8x1xf32, #tpu.memory_space<vmem>>, %arg9: memref<8x128xf32, #tpu.memory_space<vmem>>) attributes {dimension_semantics = [#tpu.dimension_semantics<arbitrary>], iteration_bounds = array<i64: 1>, scalar_prefetch = 0 : i64, scratch_operands = 0 : i64, tpu.core_type = #tpu.core_type<tc>, window_params = [{pipeline_mode = #tpu.pipeline_mode<synchronous>, transform_indices = @transform_0, window_bounds = array<i64: 128, 128>}, {pipeline_mode = #tpu.pipeline_mode<synchronous>, transform_indices = @transform_1, window_bounds = array<i64: 16, 128>}, {pipeline_mode = #tpu.pipeline_mode<synchronous>, transform_indices = @transform_2, window_bounds = array<i64: 32, 16>}, {pipeline_mode = #tpu.pipeline_mode<synchronous>, transform_indices = @transform_3, window_bounds = array<i64: 32, 1>}, {pipeline_mode = #tpu.pipeline_mode<synchronous>, transform_indices = @transform_4, window_bounds = array<i64: 32, 32>}, {pipeline_mode = #tpu.pipeline_mode<synchronous>, transform_indices = @transform_5, window_bounds = array<i64: 32, 1>}, {pipeline_mode = #tpu.pipeline_mode<synchronous>, transform_indices = @transform_6, window_bounds = array<i64: 8, 32>}, {pipeline_mode = #tpu.pipeline_mode<synchronous>, transform_indices = @transform_7, window_bounds = array<i64: 8, 1>}, {pipeline_mode = #tpu.pipeline_mode<synchronous>, transform_indices = @transform_8, window_bounds = array<i64: 8, 128>}]} {
    %c0 = arith.constant 0 : index
    %c0_0 = arith.constant 0 : index
    %0 = vector.load %arg1[%c0, %c0_0] : memref<128x128xbf16, #tpu.memory_space<vmem>>, vector<128x128xbf16>
    %c0_1 = arith.constant 0 : index
    %c0_2 = arith.constant 0 : index
    %1 = vector.load %arg2[%c0_1, %c0_2] : memref<16x128xbf16, #tpu.memory_space<vmem>>, vector<16x128xbf16>
    %c0_3 = arith.constant 0 : index
    %c0_4 = arith.constant 0 : index
    %2 = vector.load %arg3[%c0_3, %c0_4] : memref<32x16xbf16, #tpu.memory_space<vmem>>, vector<32x16xbf16>
    %c0_5 = arith.constant 0 : index
    %c0_6 = arith.constant 0 : index
    %3 = vector.load %arg4[%c0_5, %c0_6] : memref<32x1xf32, #tpu.memory_space<vmem>>, vector<32x1xf32>
    %cst = arith.constant dense<0.000000e+00> : vector<16x128xf32>
    %4 = tpu.matmul %1, %0, %cst {dimension_numbers = #tpu.dot_dimension_numbers<[1], [0], [0], [1], [0, 0, 1, 1], [], []>} : vector<16x128xbf16>, vector<128x128xbf16>, vector<16x128xf32> -> vector<16x128xf32>
    %5 = arith.truncf %4 : vector<16x128xf32> to vector<16x128xbf16>
    %cst_7 = arith.constant dense<0.000000e+00> : vector<32x128xf32>
    %6 = tpu.matmul %2, %5, %cst_7 {dimension_numbers = #tpu.dot_dimension_numbers<[1], [0], [0], [1], [0, 0, 1, 1], [], []>} : vector<32x16xbf16>, vector<16x128xbf16>, vector<32x128xf32> -> vector<32x128xf32>
    %7 = vector.broadcast %3 : vector<32x1xf32> to vector<32x128xf32>
    %8 = arith.addf %6, %7 : vector<32x128xf32>
    %cst_8 = arith.constant 0.000000e+00 : f32
    %9 = vector.broadcast %cst_8 : f32 to vector<32x128xf32>
    %10 = arith.maximumf %8, %9 : vector<32x128xf32>
    %11 = arith.truncf %10 : vector<32x128xf32> to vector<32x128xbf16>
    %c0_9 = arith.constant 0 : index
    %c0_10 = arith.constant 0 : index
    %12 = vector.load %arg5[%c0_9, %c0_10] : memref<32x32xbf16, #tpu.memory_space<vmem>>, vector<32x32xbf16>
    %c0_11 = arith.constant 0 : index
    %c0_12 = arith.constant 0 : index
    %13 = vector.load %arg6[%c0_11, %c0_12] : memref<32x1xf32, #tpu.memory_space<vmem>>, vector<32x1xf32>
    %cst_13 = arith.constant dense<0.000000e+00> : vector<32x128xf32>
    %14 = tpu.matmul %12, %11, %cst_13 {dimension_numbers = #tpu.dot_dimension_numbers<[1], [0], [0], [1], [0, 0, 1, 1], [], []>} : vector<32x32xbf16>, vector<32x128xbf16>, vector<32x128xf32> -> vector<32x128xf32>
    %15 = arith.truncf %14 : vector<32x128xf32> to vector<32x128xbf16>
    %cst_14 = arith.constant dense<0.000000e+00> : vector<32x128xf32>
    %16 = tpu.matmul %15, %0, %cst_14 {dimension_numbers = #tpu.dot_dimension_numbers<[1], [0], [0], [1], [0, 0, 1, 1], [], []>} : vector<32x128xbf16>, vector<128x128xbf16>, vector<32x128xf32> -> vector<32x128xf32>
    %17 = vector.broadcast %13 : vector<32x1xf32> to vector<32x128xf32>
    %18 = arith.addf %16, %17 : vector<32x128xf32>
    %cst_15 = arith.constant 0.000000e+00 : f32
    %19 = vector.broadcast %cst_15 : f32 to vector<32x128xf32>
    %20 = arith.maximumf %18, %19 : vector<32x128xf32>
    %21 = arith.truncf %20 : vector<32x128xf32> to vector<32x128xbf16>
    %c0_16 = arith.constant 0 : index
    %c0_17 = arith.constant 0 : index
    %22 = vector.load %arg7[%c0_16, %c0_17] : memref<8x32xbf16, #tpu.memory_space<vmem>>, vector<8x32xbf16>
    %c0_18 = arith.constant 0 : index
    %c0_19 = arith.constant 0 : index
    %23 = vector.load %arg8[%c0_18, %c0_19] : memref<8x1xf32, #tpu.memory_space<vmem>>, vector<8x1xf32>
    %cst_20 = arith.constant dense<0.000000e+00> : vector<8x128xf32>
    %24 = tpu.matmul %22, %21, %cst_20 {dimension_numbers = #tpu.dot_dimension_numbers<[1], [0], [0], [1], [0, 0, 1, 1], [], []>} : vector<8x32xbf16>, vector<32x128xbf16>, vector<8x128xf32> -> vector<8x128xf32>
    %25 = arith.truncf %24 : vector<8x128xf32> to vector<8x128xbf16>
    %cst_21 = arith.constant dense<0.000000e+00> : vector<8x128xf32>
    %26 = tpu.matmul %25, %0, %cst_21 {dimension_numbers = #tpu.dot_dimension_numbers<[1], [0], [0], [1], [0, 0, 1, 1], [], []>} : vector<8x128xbf16>, vector<128x128xbf16>, vector<8x128xf32> -> vector<8x128xf32>
    %27 = vector.broadcast %23 : vector<8x1xf32> to vector<8x128xf32>
    %28 = arith.addf %26, %27 : vector<8x128xf32>
    %c0_22 = arith.constant 0 : index
    %c0_23 = arith.constant 0 : index
    %29 = vector.load %arg9[%c0_22, %c0_23] : memref<8x128xf32, #tpu.memory_space<vmem>>, vector<8x128xf32>
    tpu.vector_store %arg9[%c0_22, %c0_23], %28 {strides = array<i32>} : memref<8x128xf32, #tpu.memory_space<vmem>>, vector<8x128xf32>,
    return
  }
  func.func @transform_0(%arg0: i32) -> (i32, i32) {
    %c0_i32 = arith.constant 0 : i32
    %c0_i32_0 = arith.constant 0 : i32
    %c0_i32_1 = arith.constant 0 : i32
    return %c0_i32, %c0_i32_0 : i32, i32
  }
  func.func @transform_1(%arg0: i32) -> (i32, i32) {
    %c0_i32 = arith.constant 0 : i32
    %c0_i32_0 = arith.constant 0 : i32
    %c0_i32_1 = arith.constant 0 : i32
    return %c0_i32, %c0_i32_0 : i32, i32
  }
  func.func @transform_2(%arg0: i32) -> (i32, i32) {
    %c0_i32 = arith.constant 0 : i32
    %c0_i32_0 = arith.constant 0 : i32
    %c0_i32_1 = arith.constant 0 : i32
    return %c0_i32, %c0_i32_0 : i32, i32
  }
  func.func @transform_3(%arg0: i32) -> (i32, i32) {
    %c0_i32 = arith.constant 0 : i32
    %c0_i32_0 = arith.constant 0 : i32
    %c0_i32_1 = arith.constant 0 : i32
    return %c0_i32, %c0_i32_0 : i32, i32
  }
  func.func @transform_4(%arg0: i32) -> (i32, i32) {
    %c0_i32 = arith.constant 0 : i32
    %c0_i32_0 = arith.constant 0 : i32
    %c0_i32_1 = arith.constant 0 : i32
    return %c0_i32, %c0_i32_0 : i32, i32
  }
  func.func @transform_5(%arg0: i32) -> (i32, i32) {
    %c0_i32 = arith.constant 0 : i32
    %c0_i32_0 = arith.constant 0 : i32
    %c0_i32_1 = arith.constant 0 : i32
    return %c0_i32, %c0_i32_0 : i32, i32
  }
  func.func @transform_6(%arg0: i32) -> (i32, i32) {
    %c0_i32 = arith.constant 0 : i32
    %c0_i32_0 = arith.constant 0 : i32
    %c0_i32_1 = arith.constant 0 : i32
    return %c0_i32, %c0_i32_0 : i32, i32
  }
  func.func @transform_7(%arg0: i32) -> (i32, i32) {
    %c0_i32 = arith.constant 0 : i32
    %c0_i32_0 = arith.constant 0 : i32
    %c0_i32_1 = arith.constant 0 : i32
    return %c0_i32, %c0_i32_0 : i32, i32
  }
  func.func @transform_8(%arg0: i32) -> (i32, i32) {
    %c0_i32 = arith.constant 0 : i32
    %c0_i32_0 = arith.constant 0 : i32
    %c0_i32_1 = arith.constant 0 : i32
    return %c0_i32, %c0_i32_0 : i32, i32
  }
}

</mosaic_0001>

<bundles_post_ra>
// kernel: tpu_custom_call.1
= control target key start
LH: loop header
LB: loop body
LE: loop exit
PB: predicated region body
PF: predicated region fallthrough
CT: control target
= control target key end

     0   :  { %v683_v1 = vmov 0.0   ;;  %vm684_vm0 = vmmov 0   ;;  %s890_s0 = inlined_call_operand.vmem [shape: bf16[128,128], index: 0, kind: input, shape index: {}]   ;;  %s891_s1 = inlined_call_operand.vmem [shape: bf16[16,128], index: 1, kind: input, shape index: {}]   ;;  %s892_s2 = inlined_call_operand.vmem [shape: bf16[32,16], index: 2, kind: input, shape index: {}]   ;;  %s893_s3 = inlined_call_operand.vmem [shape: f32[32,1], index: 3, kind: input, shape index: {}]   ;;  %s894_s4 = inlined_call_operand.vmem [shape: bf16[32,32], index: 4, kind: input, shape index: {}]   ;;  %s895_s5 = inlined_call_operand.vmem [shape: f32[32,1], index: 5, kind: input, shape index: {}]   ;;  %s896_s6 = inlined_call_operand.vmem [shape: bf16[8,32], index: 6, kind: input, shape index: {}]   ;;  %s897_s7 = inlined_call_operand.vmem [shape: f32[8,1], index: 7, kind: input, shape index: {}]   ;;  %s898_s8 = inlined_call_operand.hbm [shape: f32[8,128], index: 8, kind: output, shape index: {}]  }
   0x1   :  { %v735_v0 = vld [vmem:[%s890_s0] sm:$0xff]   ;;  %558 = vmatprep.subr.bf16.mxu0 %v683_v1  ;;  %v742_v2 = vld [vmem:[%s890_s0 + $0x8] sm:$0xff]   ;;  %574 = vmatprep.mubr.msk.bf16.mxu0 %vm684_vm0, %v683_v1  ;;  %v751_v3 = vld [vmem:[%s890_s0 + $0x10] sm:$0xff]  }
   0x2   :  { %559 = vmatpush3.bf16.msra.mxu0 %v735_v0  ;;  %v757_v4 = vld [vmem:[%s890_s0 + $0x18] sm:$0xff]  }
   0x3   :  { %560 = vmatprep.subr.bf16.mxu0 %v683_v1 }
   0x6   :  { %561 = vmatpush3.bf16.msra.mxu0 %v742_v2 }
   0x7   :  { %562 = vmatprep.subr.bf16.mxu0 %v683_v1 }
   0xa   :  { %563 = vmatpush3.bf16.msra.mxu0 %v751_v3 }
   0xb   :  { %564 = vmatprep.subr.bf16.mxu0 %v683_v1 }
   0xc   :  { %13 = vsyncpa [#allocation3], 0  ;;  %v765_v5 = vld [vmem:[%s890_s0 + $0x20] sm:$0xff]   ;;  %v772_v6 = vld [vmem:[%s890_s0 + $0x28] sm:$0xff]   ;;  %vm183_vm1 = vcmask 130048   ;;  %v685_v13 = vmov 0  }
   0xd   :  { %v779_v7 = vld [vmem:[%s890_s0 + $0x30] sm:$0xff]   ;;  %v786_v8 = vld [vmem:[%s890_s0 + $0x38] sm:$0xff]   ;;  %v654_v9 = vld [vmem:[%s891_s1] sm:$0xff]   ;;  %644 = vset.pattern.permute.xlu0 %v685_v13  ;;  %645 = vset.pattern.permute.xlu1 %v685_v13  ;;  %vm263_vm2 = vcmask 261120   ;;  %s686_s22 = smov [#allocation2]  }
   0xe   :  { %565 = vmatpush3.bf16.msra.mxu0 %v757_v4  ;;  %v655_v10 = vld [vmem:[%s892_s2] sm:$0xff]   ;;  %v55_v12 = vld [vmem:[%s893_s3 + $0x10] sm:$0xff]  ;;  %v54_v14 = vld [vmem:[%s893_s3 + $0x8] sm:$0xff]  ;;  %s494_s0 = sshll.u32 %s686_s22, 4  ;;  %s495_s0 = int_to_ptr.vmem [resolvable:$true] %s494_s0 }
   0xf   :  { %566 = vmatprep.subr.bf16.mxu0 %v683_v1  ;;  %580 = vmatprep.mubr.msk.bf16.mxu1 %vm183_vm1, %v655_v10  ;;  %v53_v11 = vld [vmem:[%s893_s3] sm:$0xff]  ;;  %v56_v15 = vld [vmem:[%s893_s3 + $0x18] sm:$0xff]  ;;  %v250_v17 = vld [vmem:[%s895_s5 + $0x8] sm:$0xff]  ;;  %s659_s1 = scalar_lea.vmem %s495_s0, 128  ;;  %p664_p1 = scmp.lt.s32.totalorder %s495_s0, %s495_s0 }
  0x10   :  { %155 = vperm.xlu0 %644, %v53_v11   ;;  %165 = vperm.xlu1 %645, %v55_v12   ;;  %v249_v16 = vld [vmem:[%s895_s5] sm:$0xff]  ;;  %v251_v18 = vld [vmem:[%s895_s5 + $0x10] sm:$0xff]  ;;  %v252_v19 = vld [vmem:[%s895_s5 + $0x18] sm:$0xff]  ;;  %p660_p0 = scmp.ne.s32.totalorder %s495_s0, %s659_s1  ;;  %p665_p2 = scmp.lt.s32.totalorder %s659_s1, %s659_s1 }
  0x11   :  { %v397_v20 = vld [vmem:[%s897_s7] sm:$0xff]  ;;  %v656_v26 = vld [vmem:[%s892_s2 + $0x8] sm:$0xff]  }
  0x12   :  { %567 = vmatpush3.bf16.msra.mxu0 %v765_v5  ;;  %v657_v27 = vld [vmem:[%s894_s4] sm:$0xff]   ;;  %v658_v46 = vld [vmem:[%s894_s4 + $0x8] sm:$0xff]   ;;  %p666_p3 = por %p665_p2, %p664_p1 }
  0x13   :  { %568 = vmatprep.subr.bf16.mxu0 %v683_v1 }
  0x14   :  { %160 = vperm.xlu0 %644, %v54_v14   ;;  %170 = vperm.xlu1 %645, %v56_v15   ;;  %p667_p4 = pnand %p666_p3, %p660_p0 }
  0x16   :  { %569 = vmatpush3.bf16.msra.mxu0 %v772_v6 }
  0x17   :  { %570 = vmatprep.subr.bf16.mxu0 %v683_v1 }
  0x18   :  { %323 = vperm.xlu0 %644, %v249_v16   ;;  %328 = vperm.xlu1 %645, %v250_v17  }
  0x1a   :  { %571 = vmatpush3.bf16.msra.mxu0 %v779_v7 }
  0x1b   :  { %572 = vmatprep.subr.bf16.mxu0 %v683_v1 }
  0x1c   :  { %333 = vperm.xlu0 %644, %v251_v18   ;;  %338 = vperm.xlu1 %645, %v252_v19  }
  0x1e   :  { %573 = vmatpush3.bf16.msra.mxu0 %v786_v8 }
  0x1f   :  { %620 = vmatprep.subr.bf16.mxu0 %v683_v1 }
  0x20   :  { %444 = vperm.xlu0 %644, %v397_v20  }
  0x21   :  { %575 = vmatmul.mubr.bf16.vlgmr.msra.gmra.mrb[0].mxu0 %v654_v9 }
  0x22   :  { %621 = vmatpush3.bf16.msra.mxu0 %v735_v0  ;;  %636 = vmatprep.mubr.msk.bf16.mxu0 %vm684_vm0, %v683_v1 }
  0x23   :  { %622 = vmatprep.subr.bf16.mxu0 %v683_v1 }
  0x26   :  { %623 = vmatpush3.bf16.msra.mxu0 %v742_v2 }
  0x27   :  { %624 = vmatprep.subr.bf16.mxu0 %v683_v1 }
  0x2a   :  { %625 = vmatpush3.bf16.msra.mxu0 %v751_v3 }
  0x2b   :  { %626 = vmatprep.subr.bf16.mxu0 %v683_v1 }
  0x2e   :  { %627 = vmatpush3.bf16.msra.mxu0 %v757_v4 }
  0x2f   :  { %628 = vmatprep.subr.bf16.mxu0 %v683_v1 }
  0x32   :  { %629 = vmatpush3.bf16.msra.mxu0 %v765_v5 }
  0x33   :  { %630 = vmatprep.subr.bf16.mxu0 %v683_v1 }
  0x36   :  { %631 = vmatpush3.bf16.msra.mxu0 %v772_v6 }
  0x37   :  { %632 = vmatprep.subr.bf16.mxu0 %v683_v1 }
  0x3a   :  { %633 = vmatpush3.bf16.msra.mxu0 %v779_v7 }
  0x3b   :  { %634 = vmatprep.subr.bf16.mxu0 %v683_v1 }
  0x3e   :  { %635 = vmatpush3.bf16.msra.mxu0 %v786_v8 }
  0x8f   :  { %v166_v28 = vpop.permute.xlu1 %165  ;;  %v156_v29 = vpop.permute.xlu0 %155 }
  0x93   :  { %v171_v33 = vpop.permute.xlu1 %170  ;;  %v161_v36 = vpop.permute.xlu0 %160 }
  0x97   :  { %v324_v53 = vpop.permute.xlu0 %323  ;;  %v329_v54 = vpop.permute.xlu1 %328 }
  0x9b   :  { %v334_v55 = vpop.permute.xlu0 %333  ;;  %v339_v59 = vpop.permute.xlu1 %338 }
  0x9f   :  { %v445_v14 = vpop.permute.xlu0 %444 }
  0xf4   :  { %v145_v21 = vpop.f32.mrb[0].mxu0 }
  0xf5   :  { %v576_v22 = vpop.f32.mrb[1].mxu0 }
  0xf6   :  { %v148_v23 = vpop.f32.mrb[2].mxu0 }
  0xf7   :  { %v152_v24 = vpack.c.bf16 %v148_v23, %v145_v21  ;;  %v577_v25 = vpop.f32.mrb[3].mxu0 }
  0xf9   :  { %578 = vmatprep.subr.bf16.mxu1 %v152_v24 }
  0xfa   :  { %579 = vmatpush3.bf16.msra.mxu1 %v152_v24 }
  0xfd   :  { %581 = vmatmul.mubr.msk.bf16.vlgmr.msra.gmra.mrb[0].mxu1 %vm183_vm1, %v656_v26 }
  0xfe   :  { %588 = vmatprep.mubr.msk.bf16.mxu1 %vm263_vm2, %v657_v27 }
 0x1d0   :  { %v582_v30 = vpop.f32.mrb[0].mxu1 }
 0x1d1   :  { %v233_v31 = vadd.f32 %v582_v30, %v166_v28  ;;  %v224_v32 = vpop.f32.mrb[1].mxu1 }
 0x1d2   :  { %v225_v34 = vadd.f32 %v224_v32, %v156_v29  ;;  %v583_v35 = vpop.f32.mrb[2].mxu1 }
 0x1d3   :  { %v236_v37 = vadd.f32 %v583_v35, %v171_v33  ;;  %v227_v38 = vpop.f32.mrb[3].mxu1  ;;  %v241_v40 = vmax.f32 %v233_v31, 0.0 }
 0x1d4   :  { %v228_v39 = vadd.f32 %v227_v38, %v161_v36  ;;  %v239_v42 = vmax.f32 %v225_v34, 0.0 }
 0x1d5   :  { %v242_v41 = vmax.f32 %v236_v37, 0.0 }
 0x1d6   :  { %v240_v43 = vmax.f32 %v228_v39, 0.0 }
 0x1d7   :  { %v244_v44 = vpack.c.bf16 %v242_v41, %v241_v40 }
 0x1d8   :  { %v243_v45 = vpack.c.bf16 %v240_v43, %v239_v42 }
 0x1da   :  { %584 = vmatprep.subr.bf16.mxu1 %v243_v45 }
 0x1db   :  { %585 = vmatpush3.bf16.msra.mxu1 %v243_v45 }
 0x1dc   :  { %586 = vmatprep.subr.bf16.mxu1 %v244_v44 }
 0x1df   :  { %587 = vmatpush3.bf16.msra.mxu1 %v244_v44 }
 0x1e0   :  { %592 = vmatprep.subr.bf16.mxu1 %v735_v0 }
 0x1e2   :  { %589 = vmatmul.mubr.msk.bf16.vlgmr.msra.gmra.mrb[4].mxu1 %vm263_vm2, %v658_v46 }
 0x1e3   :  { %593 = vmatpush3.bf16.msra.mxu1 %v735_v0 }
 0x1e4   :  { %594 = vmatprep.subr.bf16.mxu1 %v742_v2 }
 0x1e7   :  { %595 = vmatpush3.bf16.msra.mxu1 %v742_v2 }
 0x1e8   :  { %596 = vmatprep.subr.bf16.mxu1 %v751_v3 }
 0x1eb   :  { %597 = vmatpush3.bf16.msra.mxu1 %v751_v3 }
 0x1ec   :  { %598 = vmatprep.subr.bf16.mxu1 %v757_v4 }
 0x1ef   :  { %599 = vmatpush3.bf16.msra.mxu1 %v757_v4 }
 0x1f0   :  { %600 = vmatprep.subr.bf16.mxu1 %v765_v5 }
 0x1f3   :  { %601 = vmatpush3.bf16.msra.mxu1 %v765_v5 }
 0x1f4   :  { %602 = vmatprep.subr.bf16.mxu1 %v772_v6 }
 0x1f7   :  { %603 = vmatpush3.bf16.msra.mxu1 %v772_v6 }
 0x1f8   :  { %604 = vmatprep.subr.bf16.mxu1 %v779_v7 }
 0x1fb   :  { %605 = vmatpush3.bf16.msra.mxu1 %v779_v7 }
 0x1fc   :  { %606 = vmatprep.subr.bf16.mxu1 %v786_v8 }
 0x1ff   :  { %607 = vmatpush3.bf16.msra.mxu1 %v786_v8  ;;  %v396_v8 = vld [vmem:[%s896_s6] sm:$0xf] }
 0x200   :  { %612 = vmatprep.subr.bf16.mxu1 %v683_v1 }
 0x2b5   :  { %v590_v47 = vpop.f32.mrb[4].mxu1 }
 0x2b6   :  { %v304_v48 = vpop.f32.mrb[5].mxu1 }
 0x2b7   :  { %v591_v49 = vpop.f32.mrb[6].mxu1 }
 0x2b8   :  { %v320_v50 = vpack.c.bf16 %v591_v49, %v590_v47  ;;  %v307_v51 = vpop.f32.mrb[7].mxu1 }
 0x2b9   :  { %v319_v52 = vpack.c.bf16 %v307_v51, %v304_v48 }
 0x2bb   :  { %608 = vmatprep.mubr.bf16.mxu1 %v319_v52 }
 0x2bc   :  { %609 = vmatmul.mubr.bf16.vlgmr.msra.gmra.mrb[8].mxu1 %v320_v50 }
 0x2bd   :  { %616 = vmatprep.mubr.msk.bf16.mxu1 %vm684_vm0, %v683_v1 }
 0x38f   :  { %v610_v56 = vpop.f32.mrb[8].mxu1 }
 0x390   :  { %v384_v57 = vadd.f32 %v610_v56, %v334_v55  ;;  %v375_v58 = vpop.f32.mrb[9].mxu1 }
 0x391   :  { %v376_v60 = vadd.f32 %v375_v58, %v324_v53  ;;  %v611_v61 = vpop.f32.mrb[10].mxu1 }
 0x392   :  { %v387_v62 = vadd.f32 %v611_v61, %v339_v59  ;;  %v378_v63 = vpop.f32.mrb[11].mxu1  ;;  %v392_v2 = vmax.f32 %v384_v57, 0.0 }
 0x393   :  { %v379_v0 = vadd.f32 %v378_v63, %v329_v54  ;;  %v390_v4 = vmax.f32 %v376_v60, 0.0 }
 0x394   :  { %v393_v3 = vmax.f32 %v387_v62, 0.0 }
 0x395   :  { %v391_v5 = vmax.f32 %v379_v0, 0.0 }
 0x396   :  { %v395_v6 = vpack.c.bf16 %v393_v3, %v392_v2 }
 0x397   :  { %v394_v7 = vpack.c.bf16 %v391_v5, %v390_v4 }
 0x399   :  { %613 = vmatpush3.bf16.msra.mxu1 %v394_v7 }
 0x39a   :  { %614 = vmatprep.subr.bf16.mxu1 %v683_v1 }
 0x39d   :  { %615 = vmatpush3.bf16.msra.mxu1 %v395_v6 }
 0x3a0   :  { %617 = vmatmul.mubr.msk.bf16.vlgmr.msra.gmra.mrb[12].mxu1 %vm263_vm2, %v396_v8 }
 0x473   :  { %v435_v9 = vpop.f32.mrb[12].mxu1 }
 0x474   :  { %v441_v10 = vpack.c.bf16 %v435_v9, %v435_v9  ;;  %v618_v11 = vpop.f32.mrb[13].mxu1 }
 0x475   :  { %v438_v12 = vpop.f32.mrb[14].mxu1 }
 0x476   :  { %v619_v13 = vpop.f32.mrb[15].mxu1  ;;  %637 = vmatmul.mubr.bf16.vlgmr.msra.gmra.mrb[4].mxu0 %v441_v10 }
 0x549   :  { %v481_v15 = vpop.f32.mrb[4].mxu0 }
 0x54a   :  { %v482_v16 = vadd.f32 %v481_v15, %v445_v14  ;;  %v638_v17 = vpop.f32.mrb[5].mxu0 }
 0x54b   :  { %v484_v1 = vpop.f32.mrb[6].mxu0 }
 0x54c   :  { %487 = vst [vmem:[#allocation2] sm:$0xff] %v482_v16  ;;  %v639_v18 = vpop.f32.mrb[7].mxu0 }
 0x54d   :  { %670 = shalt.err (!%p667_p4)
}
 0x54e   :  { %s671_s24 = scalar_lea.hbm %s898_s8, 128 }
 0x54f   :  { %p672_p5 = scmp.ne.s32.totalorder %s898_s8, %s671_s24  ;;  %p675_p6 = scmp.lt.u32.totalorder %s671_s24, %s898_s8 }
 0x551   :  { %p677_p7 = pnand %p675_p6, %p672_p5 }
 0x553   :  { %680 = shalt.err (!%p677_p7)
}
 0x554   :  { %497 = dma.vmem_to_hbm [thread:$0]  %s495_s0, 128, %s898_s8, [#allocation3]  }
 0x555   :  { %681 = dma.done.wait [#allocation3], 128  }
 0x556   :  { %682 = vsyncadd [#allocation3], 4294967168 }
 0x557   :  { %501 = vsyncpa [#allocation3], 1 }

</bundles_post_ra>
